<compile_context>
chip_gen: v7x
topology: tpu7x:2x2x1
jax: 0.10.0
libtpu: 0.0.40
codegen_flags: <defaults>
</compile_context>

<pallas_src>
import jax
import jax.numpy as jnp
from jax.experimental import pallas as pl
from jax.experimental.pallas import tpu as pltpu


_PREF_LANES = (512, 256, 128)   # preferred lane widths (multiples of 128)
_MAX_TILE_ROWS = 1024           # 1024 x 512 f32 = 2 MiB/input tile


def _choose_lane(total):
    for cand in _PREF_LANES:
        if total % cand == 0:
            return cand
    # Fall back to the largest divisor <= 512 so the reshape stays copy-free
    # (under-utilizes lanes for pathological shapes, but never adds an extra
    # HBM pass and stays correct).
    for cand in range(min(512, total), 0, -1):
        if total % cand == 0:
            return cand
    return 1


def multi_class_bce(inputs, targets, *, max_tile_rows=_MAX_TILE_ROWS):
    """inputs, targets: (N, C, H, W); inputs are probabilities in (0, 1)."""
    N, C, H, W = inputs.shape
    total = N * C * H * W
    denom = N * H * W                      # shared per-channel mean denominator

    lane = _choose_lane(total)
    rows = total // lane

    max_tile_rows = max(8, (max_tile_rows // 8) * 8)
    if rows <= max_tile_rows:
        tile_rows = rows                   # full-dim block: always legal
    else:
        tile_rows = max_tile_rows          # multiple of 8

    tiles = -(-rows // tile_rows)
    # Megacore split (useful on v7x): only when it costs nothing (even tile
    # count).  On 1-TC chips the "parallel" axis is just an outer loop.
    n_par = 2 if (tiles >= 2 and tiles % 2 == 0) else 1
    tiles_per_part = tiles // n_par
    tail_rows = rows - (tiles - 1) * tile_rows
    needs_mask = tail_rows != tile_rows

    # Free (contiguous, row-major) reshape: no HBM copy, no padding.
    x2d = inputs.reshape(rows, lane)
    y2d = targets.reshape(rows, lane)

    def kernel(x_ref, y_ref, o_ref):
        t = pl.program_id(1)

        @pl.when(t == 0)
        def _init():
            o_ref[...] = jnp.zeros_like(o_ref)

        x = x_ref[...].astype(jnp.float32)
        y = y_ref[...].astype(jnp.float32)

        # PyTorch F.binary_cross_entropy clamps the log terms at -100.
        log_x = jnp.maximum(jnp.log(x), -100.0)
        log_1mx = jnp.maximum(jnp.log(1.0 - x), -100.0)
        # (1-y)*log(1-x) + y*log(x), rearranged to save a mul+sub per element.
        term = log_1mx + y * (log_x - log_1mx)

        if tile_rows % 8 == 0:
            def accum(v):
                # Sublane/lane-preserving partial reduce -> pure VPU vreg adds.
                o_ref[...] += v.reshape(tile_rows // 8, 8, lane).sum(axis=0)
        else:
            def accum(v):
                # Tiny single-tile case (rows < 8): cheap sublane reduce.
                o_ref[0:1, :] += v.sum(axis=0, keepdims=True)

        if needs_mask:
            gt = pl.program_id(0) * pl.num_programs(1) + t
            is_last = gt == (tiles - 1)

            @pl.when(is_last)
            def _masked():
                row = jax.lax.broadcasted_iota(jnp.int32, term.shape, 0)
                accum(jnp.where(row < tail_rows, term, 0.0))

            @pl.when(jnp.logical_not(is_last))
            def _full():
                accum(term)
        else:
            accum(term)

    in_map = lambda p, t: (p * tiles_per_part + t, 0)

    partials = pl.pallas_call(
        kernel,
        out_shape=jax.ShapeDtypeStruct((n_par * 8, lane), jnp.float32),
        grid_spec=pltpu.PrefetchScalarGridSpec(
            num_scalar_prefetch=0,
            grid=(n_par, tiles_per_part),
            in_specs=[
                pl.BlockSpec((tile_rows, lane), in_map),
                pl.BlockSpec((tile_rows, lane), in_map),
            ],
            out_specs=pl.BlockSpec((8, lane), lambda p, t: (p, 0)),
        ),
        compiler_params=pltpu.CompilerParams(
            dimension_semantics=("parallel", "arbitrary")),
    )(x2d, y2d)

    # Tiny final cross-lane reduce + negate + scale, once, outside the kernel.
    return -jnp.sum(partials) / denom


def _reference(inputs, targets):
    # Pure-JAX reference mirroring the PyTorch per-channel loop.
    loss = 0.0
    for i in range(inputs.shape[1]):
        yp = inputs[:, i].astype(jnp.float32)
        yt = targets[:, i].astype(jnp.float32)
        lx = jnp.maximum(jnp.log(yp), -100.0)
        l1mx = jnp.maximum(jnp.log(1.0 - yp), -100.0)
        loss = loss + jnp.mean(-(yt * lx + (1.0 - yt) * l1mx))
    return loss


if __name__ == "__main__":
    mcbce = jax.jit(multi_class_bce, static_argnames=("max_tile_rows",))

    key = jax.random.PRNGKey(0)
    k1, k2, k3, k4 = jax.random.split(key, 4)

    # Main example: (N, C, H, W) = (2, 4, 16, 16); inputs are probabilities.
    N, C, H, W = 2, 4, 16, 16
    inputs = jax.random.uniform(k1, (N, C, H, W), dtype=jnp.float32,
                                minval=0.01, maxval=0.99)
    targets = jax.random.bernoulli(k2, 0.5, (N, C, H, W)).astype(jnp.float32)

    loss = mcbce(inputs, targets)
    jax.block_until_ready(loss)
    ref = _reference(inputs, targets)
    assert jnp.allclose(loss, ref, rtol=1e-4, atol=1e-6), (loss, ref)

    # Second check: forces multiple tiles, the megacore-split axis and the
    # masked ragged last tile (small max_tile_rows on a small tensor).
    N2, C2, H2, W2 = 1, 2, 11, 64
    inputs2 = jax.random.uniform(k3, (N2, C2, H2, W2), dtype=jnp.float32,
                                 minval=0.01, maxval=0.99)
    targets2 = jax.random.bernoulli(k4, 0.5, (N2, C2, H2, W2)).astype(jnp.float32)

    loss2 = mcbce(inputs2, targets2, max_tile_rows=8)
    jax.block_until_ready(loss2)
    ref2 = _reference(inputs2, targets2)
    assert jnp.allclose(loss2, ref2, rtol=1e-4, atol=1e-6), (loss2, ref2)

    print("KERNEL_OK")
</pallas_src>

<mosaic_0001>
module attributes {stable_mosaic.version = 11 : i64} {
  func.func @kernel(%arg0: i32, %arg1: i32, %arg2: memref<4x512xf32, #tpu.memory_space<vmem>>, %arg3: memref<4x512xf32, #tpu.memory_space<vmem>>, %arg4: memref<8x512xf32, #tpu.memory_space<vmem>>) attributes {dimension_semantics = [#tpu.dimension_semantics<parallel>, #tpu.dimension_semantics<arbitrary>], iteration_bounds = array<i64: 1, 1>, scalar_prefetch = 0 : i64, scratch_operands = 0 : i64, tpu.core_type = #tpu.core_type<tc>, window_params = [{transform_indices = @transform_0, window_bounds = array<i64: 4, 512>}, {transform_indices = @transform_1, window_bounds = array<i64: 4, 512>}, {transform_indices = @transform_2, window_bounds = array<i64: 8, 512>}]} {
    %c0_i32 = arith.constant 0 : i32
    %0 = arith.cmpi eq, %arg1, %c0_i32 : i32
    %1 = arith.extui %0 : i1 to i32
    %c0_i32_0 = arith.constant 0 : i32
    %2 = arith.cmpi ne, %1, %c0_i32_0 : i32
    scf.if %2 {
      %cst_11 = arith.constant 0.000000e+00 : f32
      %21 = vector.broadcast %cst_11 : f32 to vector<8x512xf32>
      %c0_12 = arith.constant 0 : index
      %c0_13 = arith.constant 0 : index
      %22 = vector.load %arg4[%c0_12, %c0_13] : memref<8x512xf32, #tpu.memory_space<vmem>>, vector<8x512xf32>
      tpu.vector_store %arg4[%c0_12, %c0_13], %21 {strides = array<i32>} : memref<8x512xf32, #tpu.memory_space<vmem>>, vector<8x512xf32>,
    } else {
    }
    %c0 = arith.constant 0 : index
    %c0_1 = arith.constant 0 : index
    %3 = vector.load %arg2[%c0, %c0_1] : memref<4x512xf32, #tpu.memory_space<vmem>>, vector<4x512xf32>
    %c0_2 = arith.constant 0 : index
    %c0_3 = arith.constant 0 : index
    %4 = vector.load %arg3[%c0_2, %c0_3] : memref<4x512xf32, #tpu.memory_space<vmem>>, vector<4x512xf32>
    %5 = math.log %3 : vector<4x512xf32>
    %cst = arith.constant -1.000000e+02 : f32
    %6 = vector.broadcast %cst : f32 to vector<4x512xf32>
    %7 = arith.maximumf %5, %6 : vector<4x512xf32>
    %cst_4 = arith.constant 1.000000e+00 : f32
    %8 = vector.broadcast %cst_4 : f32 to vector<4x512xf32>
    %9 = arith.subf %8, %3 : vector<4x512xf32>
    %10 = math.log %9 : vector<4x512xf32>
    %cst_5 = arith.constant -1.000000e+02 : f32
    %11 = vector.broadcast %cst_5 : f32 to vector<4x512xf32>
    %12 = arith.maximumf %10, %11 : vector<4x512xf32>
    %13 = arith.subf %7, %12 : vector<4x512xf32>
    %14 = arith.mulf %4, %13 : vector<4x512xf32>
    %15 = arith.addf %12, %14 : vector<4x512xf32>
    %c0_6 = arith.constant 0 : index
    %c0_7 = arith.constant 0 : index
    %16 = vector.load %arg4[%c0_6, %c0_7] : memref<8x512xf32, #tpu.memory_space<vmem>>, vector<1x512xf32>
    %cst_8 = arith.constant dense<0.000000e+00> : vector<512xf32>
    %17 = vector.multi_reduction <add>, %15, %cst_8 [0] : vector<4x512xf32> to vector<512xf32>
    %18 = vector.shape_cast %17 : vector<512xf32> to vector<1x512xf32>
    %19 = arith.addf %16, %18 : vector<1x512xf32>
    %c0_9 = arith.constant 0 : index
    %c0_10 = arith.constant 0 : index
    %20 = vector.load %arg4[%c0_9, %c0_10] : memref<8x512xf32, #tpu.memory_space<vmem>>, vector<1x512xf32>
    tpu.vector_store %arg4[%c0_9, %c0_10], %19 {strides = array<i32>} : memref<8x512xf32, #tpu.memory_space<vmem>>, vector<1x512xf32>,
    return
  }
  func.func @transform_0(%arg0: i32, %arg1: i32) -> (i32, i32) {
    %c1_i32 = arith.constant 1 : i32
    %0 = arith.muli %arg0, %c1_i32 : i32
    %1 = arith.addi %0, %arg1 : i32
    %c0_i32 = arith.constant 0 : i32
    %c0_i32_0 = arith.constant 0 : i32
    return %1, %c0_i32 : i32, i32
  }
  func.func @transform_1(%arg0: i32, %arg1: i32) -> (i32, i32) {
    %c1_i32 = arith.constant 1 : i32
    %0 = arith.muli %arg0, %c1_i32 : i32
    %1 = arith.addi %0, %arg1 : i32
    %c0_i32 = arith.constant 0 : i32
    %c0_i32_0 = arith.constant 0 : i32
    return %1, %c0_i32 : i32, i32
  }
  func.func @transform_2(%arg0: i32, %arg1: i32) -> (i32, i32) {
    %c0_i32 = arith.constant 0 : i32
    %c0_i32_0 = arith.constant 0 : i32
    return %arg0, %c0_i32 : i32, i32
  }
}

</mosaic_0001>

<bundles_post_ra>
// kernel: multi_class_bce.1
= control target key start
LH: loop header
LB: loop body
LE: loop exit
PB: predicated region body
PF: predicated region fallthrough
CT: control target
= control target key end

     0   :  { %v181_v0 = vmov 0.0   ;;  %vm90_vm0 = vcmask 1043456   ;;  %v182_v39 = vmov 1966171168   ;;  %v128_v41 = vlaneseq  ;;  %s228_s2 = inlined_call_operand.vmem [shape: f32[8,512], index: 2, kind: output, shape index: {}]   ;;  %s229_s0 = inlined_call_operand.vmem [shape: f32[4,512], index: 0, kind: input, shape index: {}]   ;;  %s230_s1 = inlined_call_operand.vmem [shape: f32[4,512], index: 1, kind: input, shape index: {}]  }
   0x1   :  { %55 = vst [vmem:[%s228_s2] sm:$0xff] %v181_v0  ;;  %56 = vst [vmem:[%s228_s2 + $0x8] sm:$0xff] %v181_v0  ;;  %v59_v1 = vld [vmem:[%s229_s0] sm:$0xff]  ;;  %v60_v2 = vld [vmem:[%s229_s0 + $0x8] sm:$0xff]  ;;  %v126_v40 = vunpack.c.l.s4 %v182_v39 }
   0x2   :  { %57 = vst [vmem:[%s228_s2 + $0x10] sm:$0xff] %v181_v0  ;;  %58 = vst [vmem:[%s228_s2 + $0x18] sm:$0xff] %v181_v0  ;;  %173 = vlog2.f32 %v59_v1  ;;  %v69_v3 = vsub.f32 1.0, %v59_v1  ;;  %v70_v4 = vsub.f32 1.0, %v60_v2  ;;  %v61_v16 = vld [vmem:[%s230_s1] sm:$0xff]  ;;  %v62_v18 = vld [vmem:[%s230_s1 + $0x8] sm:$0xff] }
   0x3   :  { %175 = vlog2.f32 %v60_v2  ;;  %v127_v50 = vunpack.c.0.s8 %v126_v40  ;;  %v129_v51 = vshrl.u32 %v128_v41, 7  ;;  %vm151_vm1 = vcmp.lt.s32.totalorder %v128_v41, 512 }
   0x4   :  { %177 = vlog2.f32 %v69_v3 }
   0x5   :  { %179 = vlog2.f32 %v70_v4  ;;  %v130_v59 = vsub.s32 %v127_v50, %v129_v51 }
   0x9   :  { %v83_v2 = vld [vmem:[%s228_s2] ss:$8 sm:$0xf] }
   0xc   :  { %v174_v5 = vpop.eup %173 }
   0xd   :  { %v176_v6 = vpop.eup %175  ;;  %v64_v7 = vmul.f32 0.6931472, %v174_v5 }
   0xe   :  { %v178_v8 = vpop.eup %177  ;;  %v66_v9 = vmul.f32 0.6931472, %v176_v6 }
   0xf   :  { %v180_v10 = vpop.eup %179  ;;  %v67_v11 = vmax.f32 %v64_v7, -100.0  ;;  %v72_v12 = vmul.f32 0.6931472, %v178_v8 }
  0x10   :  { %v68_v13 = vmax.f32 %v66_v9, -100.0  ;;  %v74_v14 = vmul.f32 0.6931472, %v180_v10 }
  0x11   :  { %v75_v15 = vmax.f32 %v72_v12, -100.0 }
  0x12   :  { %v76_v17 = vmax.f32 %v74_v14, -100.0 }
  0x13   :  { %v77_v19 = vsub.f32 %v67_v11, %v75_v15 }
  0x14   :  { %v78_v20 = vsub.f32 %v68_v13, %v76_v17 }
  0x15   :  { %v79_v21 = vmul.f32 %v77_v19, %v61_v16 }
  0x16   :  { %v80_v22 = vmul.f32 %v78_v20, %v62_v18 }
  0x17   :  { %v81_v23 = vadd.f32 %v79_v21, %v75_v15 }
  0x18   :  { %v82_v24 = vadd.f32 %v80_v22, %v76_v17 }
  0x19   :  { %v86_v25 = vcombine.high %v81_v23, %v81_v23  ;;  %v91_v26 = vsel %vm90_vm0, %v81_v23, 0.0 }
  0x1a   :  { %v87_v27 = vcombine.high %v82_v24, %v82_v24  ;;  %v92_v28 = vrot.slane %v91_v26, 4  ;;  %v105_v29 = vsel %vm90_vm0, %v82_v24, 0.0 }
  0x1b   :  { %v98_v30 = vsel %vm90_vm0, %v86_v25, 0.0  ;;  %v106_v31 = vrot.slane %v105_v29, 4 }
  0x1c   :  { %v93_v32 = vadd.f32 %v92_v28, %v91_v26  ;;  %v99_v33 = vrot.slane %v98_v30, 4  ;;  %v112_v34 = vsel %vm90_vm0, %v87_v27, 0.0 }
  0x1d   :  { %v107_v35 = vadd.f32 %v106_v31, %v105_v29  ;;  %v113_v36 = vrot.slane %v112_v34, 4 }
  0x1e   :  { %v94_v37 = vrot.slane %v93_v32, 2  ;;  %v100_v38 = vadd.f32 %v99_v33, %v98_v30 }
  0x1f   :  { %v108_v42 = vrot.slane %v107_v35, 2  ;;  %v114_v43 = vadd.f32 %v113_v36, %v112_v34 }
  0x20   :  { %v95_v44 = vadd.f32 %v94_v37, %v93_v32  ;;  %v101_v45 = vrot.slane %v100_v38, 2 }
  0x21   :  { %v109_v46 = vadd.f32 %v108_v42, %v107_v35  ;;  %v115_v47 = vrot.slane %v114_v43, 2 }
  0x22   :  { %v96_v48 = vrot.slane %v95_v44, 1  ;;  %v102_v49 = vadd.f32 %v101_v45, %v100_v38 }
  0x23   :  { %v110_v52 = vrot.slane %v109_v46, 1  ;;  %v116_v53 = vadd.f32 %v115_v47, %v114_v43 }
  0x24   :  { %v97_v54 = vadd.f32 %v96_v48, %v95_v44  ;;  %v103_v55 = vrot.slane %v102_v49, 1 }
  0x25   :  { %v111_v56 = vadd.f32 %v110_v52, %v109_v46  ;;  %v117_v57 = vrot.slane %v116_v53, 1 }
  0x26   :  { %v104_v58 = vadd.f32 %v103_v55, %v102_v49 }
  0x27   :  { %v118_v60 = vadd.f32 %v117_v57, %v116_v53 }
  0x28   :  { %v123_v61 = vcombine.low %v97_v54, %v104_v58 }
  0x29   :  { %v124_v62 = vcombine.low %v111_v56, %v118_v60 }
  0x2a   :  { %v131_v63 = vrot.slane %v123_v61, %v130_v59 }
  0x2b   :  { %v138_v0 = vrot.slane %v124_v62, %v130_v59 }
  0x2d   :  { %v139_v1 = vcombine.low %v131_v63, %v138_v0 }
  0x2f   :  { %v146_v3 = vrot.slane %v139_v1, %v130_v59 }
  0x31   :  { %v148_v4 = vadd.f32 %v146_v3, %v83_v2 }
  0x33   :  { %153 = vst.msk [vmem:[%s228_s2] ss:$8 sm:$0xf] %vm151_vm1, %v148_v4 }

</bundles_post_ra>
